<compile_context>
chip_gen: v7x
topology: tpu7x:2x2x1
jax: 0.10.0
libtpu: 0.0.40
codegen_flags: <defaults>
</compile_context>

<pallas_src>
import jax
import jax.numpy as jnp
from jax.experimental import pallas as pl
from jax.experimental.pallas import tpu as pltpu

# ---- model hyper-parameters (small, consistent with the module's __init__) ----
EMBEDDING_DIM = 32
HIDDEN_DIM = 32
LAST_N = 3
VOCAB_SIZE = 64

IN_DIM = EMBEDDING_DIM * (LAST_N + 1)   # 128 = concat([ctx, last_0..last_{N-1}])
LAST_DIM = EMBEDDING_DIM * LAST_N       # 96
B_TILE_MAX = 512                        # big tiles: amortize ~0.35us/step overhead


# ----------------------------- Pallas kernel ----------------------------------
def classifier_kernel(ctx_ref, last_ref, wc_ref, wl_ref, b_ref, o_ref):
    # Two bf16 MXU GEMMs (K=32 and K=96) accumulated in f32, then f32 bias add.
    acc = jnp.dot(ctx_ref[...], wc_ref[...], preferred_element_type=jnp.float32)
    acc = acc + jnp.dot(last_ref[...], wl_ref[...],
                        preferred_element_type=jnp.float32)
    o_ref[...] = acc + b_ref[...]


# --------------------------- host-side weight fold -----------------------------
def fold_params(params):
    """Fold context/last_n linears -> global_linear -> classifier into one
    (IN_DIM, V) weight (split into the context rows and the last_n rows, bf16)
    and an f32 (1, V) bias."""
    wc, bc, wl, bl, wg, bg, wcls, bcls = params
    E, H, N = EMBEDDING_DIM, HIDDEN_DIM, LAST_N

    # Stage-1 block-diagonal weight acting on concat([ctx, last_0..last_{N-1}]).
    w1 = jnp.zeros((E * (N + 1), H * (N + 1)), jnp.float32)
    w1 = w1.at[0:E, 0:H].set(wc)
    for i in range(1, N + 1):                        # shared last_n weight everywhere
        w1 = w1.at[i * E:(i + 1) * E, i * H:(i + 1) * H].set(wl)
    b1 = jnp.concatenate([bc[0]] + [bl[0]] * N)      # (H*(N+1),)

    w_fold = w1 @ wg @ wcls                          # (IN_DIM, V)
    b_fold = (b1 @ wg + bg[0]) @ wcls + bcls[0]      # (V,)

    w_ctx = w_fold[:E].astype(jnp.bfloat16)          # (E, V)      bf16: halve DMA bytes
    w_last = w_fold[E:].astype(jnp.bfloat16)         # (N*E, V)
    b = b_fold[None].astype(jnp.float32)             # (1, V)      bias add stays f32
    return w_ctx, w_last, b


# ------------------------------- tiling choice ---------------------------------
def _pick_b_tile(B):
    """Largest useful batch tile; keep >=2 grid steps when B is big enough so the
    'parallel' axis actually splits across v7x's 2 TensorCores."""
    if B > B_TILE_MAX:
        return B_TILE_MAX                                  # multiple of 8
    if B >= 64:
        half = -(-B // 2)                                  # ceil(B/2)
        return ((half + 7) // 8) * 8                       # multiple of 8, < B
    return B                                               # tiny batch: full-extent tile


# ------------------------------- forward wrappers ------------------------------
@jax.jit
def classifier_forward_batched(context, last_n_embeddings, w_ctx, w_last, b_fold):
    """context: (B, E) ; last_n_embeddings: (B, LAST_N, E) -> (B, VOCAB_SIZE) f32."""
    B = context.shape[0]
    ctx = context.astype(jnp.bfloat16)                                   # (B, E)
    last = last_n_embeddings.reshape(B, LAST_DIM).astype(jnp.bfloat16)   # (B, N*E)

    bt = _pick_b_tile(B)
    n_tiles = pl.cdiv(B, bt)          # ragged tail block OK: rows beyond B are clipped

    cost = pl.CostEstimate(
        flops=2 * B * IN_DIM * VOCAB_SIZE,
        transcendentals=0,
        bytes_accessed=(B * IN_DIM * 2                # bf16 activation reads
                        + IN_DIM * VOCAB_SIZE * 2     # bf16 weight reads
                        + VOCAB_SIZE * 4              # f32 bias
                        + B * VOCAB_SIZE * 4))        # f32 output writes

    out = pl.pallas_call(
        classifier_kernel,
        out_shape=jax.ShapeDtypeStruct((B, VOCAB_SIZE), jnp.float32),
        grid=(n_tiles,),
        in_specs=[
            pl.BlockSpec((bt, EMBEDDING_DIM), lambda i: (i, 0)),     # ctx stream
            pl.BlockSpec((bt, LAST_DIM), lambda i: (i, 0)),          # last_n stream
            pl.BlockSpec((EMBEDDING_DIM, VOCAB_SIZE), lambda i: (0, 0)),  # VMEM-resident
            pl.BlockSpec((LAST_DIM, VOCAB_SIZE), lambda i: (0, 0)),       # VMEM-resident
            pl.BlockSpec((1, VOCAB_SIZE), lambda i: (0, 0)),              # bias resident
        ],
        out_specs=pl.BlockSpec((bt, VOCAB_SIZE), lambda i: (i, 0)),  # no padded lanes
        compiler_params=pltpu.CompilerParams(
            dimension_semantics=("parallel",)),                      # 2-TC split on v7x
        cost_estimate=cost,
    )(ctx, last, w_ctx, w_last, b_fold)
    # TODO(synk): if DMA is still exposed on v7x after profiling, add
    # pipeline_mode=pl.Buffered(3) to the two activation BlockSpecs.
    return out


def classifier_forward(context, last_n_embeddings, w_ctx, w_last, b_fold):
    """Original single-example interface: context (E,), last_n (LAST_N, E) -> (V,)."""
    out = classifier_forward_batched(context[None], last_n_embeddings[None],
                                     w_ctx, w_last, b_fold)
    return out[0]


# --------------------------- params + pure-JAX reference -----------------------
def init_params(key):
    """Deterministic init mimicking nn.Linear's U(-1/sqrt(in), 1/sqrt(in)).
    Weights stored as (in, out) so every linear is x @ W + b."""
    def linear(k, fan_in, fan_out):
        kw, kb = jax.random.split(k)
        bound = 1.0 / jnp.sqrt(fan_in)
        w = jax.random.uniform(kw, (fan_in, fan_out), jnp.float32, -bound, bound)
        b = jax.random.uniform(kb, (1, fan_out), jnp.float32, -bound, bound)
        return w, b

    k1, k2, k3, k4 = jax.random.split(key, 4)
    wc, bc = linear(k1, EMBEDDING_DIM, HIDDEN_DIM)                 # context_linear
    wl, bl = linear(k2, EMBEDDING_DIM, HIDDEN_DIM)                 # shared last_n linear
    wg, bg = linear(k3, HIDDEN_DIM * (LAST_N + 1), HIDDEN_DIM)     # global_linear
    wcls, bcls = linear(k4, HIDDEN_DIM, VOCAB_SIZE)                # classifier
    return wc, bc, wl, bl, wg, bg, wcls, bcls


def reference_forward(context, last_n_embeddings, params):
    """Pure-JAX f32 reference reproducing the PyTorch forward exactly (per example)."""
    wc, bc, wl, bl, wg, bg, wcls, bcls = params
    context = context.astype(jnp.float32)
    last = last_n_embeddings.astype(jnp.float32)
    h_ctx = context @ wc + bc[0]
    hs = [h_ctx] + [last[i] @ wl + bl[0] for i in range(LAST_N)]
    x = jnp.concatenate(hs, axis=0)
    g = x @ wg + bg[0]
    return g @ wcls + bcls[0]


# ------------------------------------ demo -------------------------------------
if __name__ == "__main__":
    key = jax.random.PRNGKey(0)
    kp, kc, kl = jax.random.split(key, 3)

    params = init_params(kp)
    w_ctx, w_last, b_fold = fold_params(params)

    B = 300  # -> tile 152, grid=(2,): exercises the 2-TC split + a ragged tail block
    context = jax.random.normal(kc, (B, EMBEDDING_DIM), jnp.float32)
    last_n_embeddings = jax.random.normal(kl, (B, LAST_N, EMBEDDING_DIM), jnp.float32)

    out = jax.block_until_ready(
        classifier_forward_batched(context, last_n_embeddings, w_ctx, w_last, b_fold))

    ref = jax.vmap(lambda c, l: reference_forward(c, l, params))(context,
                                                                 last_n_embeddings)
    assert out.shape == (B, VOCAB_SIZE)
    # bf16 activations/weights with f32 accumulation: quantization-level tolerance.
    assert jnp.allclose(out, ref, atol=2e-2, rtol=2e-2), "batched mismatch vs reference"

    # also exercise the original single-example module interface
    out1 = jax.block_until_ready(
        classifier_forward(context[0], last_n_embeddings[0], w_ctx, w_last, b_fold))
    assert out1.shape == (VOCAB_SIZE,)
    assert jnp.allclose(out1, ref[0], atol=2e-2, rtol=2e-2), "single mismatch vs reference"

    print("KERNEL_OK")
</pallas_src>

<mosaic_0001>
module attributes {stable_mosaic.version = 11 : i64} {
  func.func @classifier_kernel(%arg0: i32, %arg1: memref<152x32xbf16, #tpu.memory_space<vmem>>, %arg2: memref<152x96xbf16, #tpu.memory_space<vmem>>, %arg3: memref<32x64xbf16, #tpu.memory_space<vmem>>, %arg4: memref<96x64xbf16, #tpu.memory_space<vmem>>, %arg5: memref<1x64xf32, #tpu.memory_space<vmem>>, %arg6: memref<152x64xf32, #tpu.memory_space<vmem>>) attributes {dimension_semantics = [#tpu.dimension_semantics<parallel>], iteration_bounds = array<i64: 2>, scalar_prefetch = 0 : i64, scratch_operands = 0 : i64, tpu.core_type = #tpu.core_type<tc>, window_params = [{transform_indices = @transform_0, window_bounds = array<i64: 152, 32>}, {transform_indices = @transform_1, window_bounds = array<i64: 152, 96>}, {pipeline_mode = #tpu.pipeline_mode<synchronous>, transform_indices = @transform_2, window_bounds = array<i64: 32, 64>}, {pipeline_mode = #tpu.pipeline_mode<synchronous>, transform_indices = @transform_3, window_bounds = array<i64: 96, 64>}, {pipeline_mode = #tpu.pipeline_mode<synchronous>, transform_indices = @transform_4, window_bounds = array<i64: 1, 64>}, {transform_indices = @transform_5, window_bounds = array<i64: 152, 64>}]} {
    %c0 = arith.constant 0 : index
    %c0_0 = arith.constant 0 : index
    %0 = vector.load %arg1[%c0, %c0_0] : memref<152x32xbf16, #tpu.memory_space<vmem>>, vector<152x32xbf16>
    %c0_1 = arith.constant 0 : index
    %c0_2 = arith.constant 0 : index
    %1 = vector.load %arg3[%c0_1, %c0_2] : memref<32x64xbf16, #tpu.memory_space<vmem>>, vector<32x64xbf16>
    %cst = arith.constant dense<0.000000e+00> : vector<152x64xf32>
    %2 = tpu.matmul %0, %1, %cst {dimension_numbers = #tpu.dot_dimension_numbers<[1], [0], [0], [1], [0, 0, 1, 1], [], []>} : vector<152x32xbf16>, vector<32x64xbf16>, vector<152x64xf32> -> vector<152x64xf32>
    %c0_3 = arith.constant 0 : index
    %c0_4 = arith.constant 0 : index
    %3 = vector.load %arg2[%c0_3, %c0_4] : memref<152x96xbf16, #tpu.memory_space<vmem>>, vector<152x96xbf16>
    %c0_5 = arith.constant 0 : index
    %c0_6 = arith.constant 0 : index
    %4 = vector.load %arg4[%c0_5, %c0_6] : memref<96x64xbf16, #tpu.memory_space<vmem>>, vector<96x64xbf16>
    %cst_7 = arith.constant dense<0.000000e+00> : vector<152x64xf32>
    %5 = tpu.matmul %3, %4, %cst_7 {dimension_numbers = #tpu.dot_dimension_numbers<[1], [0], [0], [1], [0, 0, 1, 1], [], []>} : vector<152x96xbf16>, vector<96x64xbf16>, vector<152x64xf32> -> vector<152x64xf32>
    %6 = arith.addf %2, %5 : vector<152x64xf32>
    %c0_8 = arith.constant 0 : index
    %c0_9 = arith.constant 0 : index
    %7 = vector.load %arg5[%c0_8, %c0_9] : memref<1x64xf32, #tpu.memory_space<vmem>>, vector<1x64xf32>
    %8 = vector.broadcast %7 : vector<1x64xf32> to vector<152x64xf32>
    %9 = arith.addf %6, %8 : vector<152x64xf32>
    %c0_10 = arith.constant 0 : index
    %c0_11 = arith.constant 0 : index
    %10 = vector.load %arg6[%c0_10, %c0_11] : memref<152x64xf32, #tpu.memory_space<vmem>>, vector<152x64xf32>
    tpu.vector_store %arg6[%c0_10, %c0_11], %9 {strides = array<i32>} : memref<152x64xf32, #tpu.memory_space<vmem>>, vector<152x64xf32>,
    return
  }
  func.func @transform_0(%arg0: i32) -> (i32, i32) {
    %c0_i32 = arith.constant 0 : i32
    %c0_i32_0 = arith.constant 0 : i32
    return %arg0, %c0_i32 : i32, i32
  }
  func.func @transform_1(%arg0: i32) -> (i32, i32) {
    %c0_i32 = arith.constant 0 : i32
    %c0_i32_0 = arith.constant 0 : i32
    return %arg0, %c0_i32 : i32, i32
  }
  func.func @transform_2(%arg0: i32) -> (i32, i32) {
    %c0_i32 = arith.constant 0 : i32
    %c0_i32_0 = arith.constant 0 : i32
    %c0_i32_1 = arith.constant 0 : i32
    return %c0_i32, %c0_i32_0 : i32, i32
  }
  func.func @transform_3(%arg0: i32) -> (i32, i32) {
    %c0_i32 = arith.constant 0 : i32
    %c0_i32_0 = arith.constant 0 : i32
    %c0_i32_1 = arith.constant 0 : i32
    return %c0_i32, %c0_i32_0 : i32, i32
  }
  func.func @transform_4(%arg0: i32) -> (i32, i32) {
    %c0_i32 = arith.constant 0 : i32
    %c0_i32_0 = arith.constant 0 : i32
    %c0_i32_1 = arith.constant 0 : i32
    return %c0_i32, %c0_i32_0 : i32, i32
  }
  func.func @transform_5(%arg0: i32) -> (i32, i32) {
    %c0_i32 = arith.constant 0 : i32
    %c0_i32_0 = arith.constant 0 : i32
    return %arg0, %c0_i32 : i32, i32
  }
}

</mosaic_0001>

<bundles_post_ra>
// kernel: classifier_forward_batched.1
= control target key start
LH: loop header
LB: loop body
LE: loop exit
PB: predicated region body
PF: predicated region fallthrough
CT: control target
= control target key end

     0   :  { %s1082_s18 = smov 0   ;;  %s1238_s0 = inlined_call_operand.vmem [shape: bf16[300,32], index: 0, kind: input, shape index: {}]   ;;  %s1239_s1 = inlined_call_operand.vmem [shape: bf16[300,96], index: 1, kind: input, shape index: {}]   ;;  %s1240_s2 = inlined_call_operand.vmem [shape: bf16[32,64], index: 2, kind: input, shape index: {}]   ;;  %s1241_s3 = inlined_call_operand.vmem [shape: bf16[96,64], index: 3, kind: input, shape index: {}]   ;;  %s1242_s4 = inlined_call_operand.vmem [shape: f32[1,64], index: 4, kind: input, shape index: {}]   ;;  %s1243_s5 = inlined_call_operand.vmem [shape: f32[300,64], index: 5, kind: output, shape index: {}]  }
   0x1 LB: > { %s849_s19 = sadd.s32 4294967295, %s1050_s18   ;;  %p853_p0 = scmp.ge.s32.totalorder %s1050_s18, 1  ;;  %s1050_s18 = sphi %s1082_s18, %s15_s18  }
   0x2   : > { %p199_p1 = scmp.lt.s32.totalorder %s1050_s18, 3 }
   0x4   : > { %p200_p2 = pnand %p853_p0, %p199_p1 }
   0x5   : > { %v1016_v0 = vld [vmem:[%s1241_s3] sm:$0xff] (!%p200_p2)   ;;  %s232_s22 = smul.u32 (!%p200_p2), 19, %s849_s19  ;;  %v1017_v1 = vld [vmem:[%s1241_s3 + $0x8] sm:$0xff] (!%p200_p2)   ;;  %v1018_v2 = vld [vmem:[%s1241_s3 + $0x10] sm:$0xff] (!%p200_p2)   ;;  %vm592_vm0 = vcmask (!%p200_p2), 261120   ;;  %vm389_vm1 = vcmask (!%p200_p2), 785408  }
   0x6   : > { %203 = sbr.rel (%p200_p2) target bundleno = 282 (0x11a), region = 40  ;;  %936 = vmatprep.subr.bf16.mxu1 (!%p200_p2), %v1016_v0  ;;  %v1020_v3 = vld [vmem:[%s1240_s2] sm:$0xff] (!%p200_p2)   ;;  %v1022_v4 = vld [vmem:[%s1240_s2 + $0x8] sm:$0xff] (!%p200_p2)   ;;  %v1019_v5 = vld [vmem:[%s1241_s3 + $0x18] sm:$0xff] (!%p200_p2)   ;;  %vm761_vm2 = vcmask (!%p200_p2), 523264  }
   0x7   : > { %p233_p3 = scmp.lt.s32.totalorder (!%p200_p2), %s232_s22, 37  ;;  %937 = vmatpush3.bf16.msra.mxu1 (!%p200_p2), %v1016_v0  ;;  %968 = vmatprep.subr.bf16.mxu0 (!%p200_p2), %v1020_v3  ;;  %v1021_v9 = vld [vmem:[%s1241_s3 + $0x20] sm:$0xff] (!%p200_p2)   ;;  %v1023_v11 = vld [vmem:[%s1241_s3 + $0x28] sm:$0xff] (!%p200_p2)  }
   0x8   : > { %938 = vmatprep.subr.bf16.mxu1 (!%p200_p2), %v1017_v1  ;;  %969 = vmatpush3.bf16.msra.mxu0 (!%p200_p2), %v1020_v3  ;;  %v1171_v37 = vld [vmem:[%s1242_s4] ss:$0 sm:$0xff] (!%p200_p2) }
   0x9   : > { %970 = vmatprep.subr.bf16.mxu0 (!%p200_p2), %v1022_v4 }
   0xb   : > { %939 = vmatpush3.bf16.msra.mxu1 (!%p200_p2), %v1017_v1 }
   0xc   : > { %940 = vmatprep.subr.bf16.mxu1 (!%p200_p2), %v1018_v2  ;;  %971 = vmatpush3.bf16.msra.mxu0 (!%p200_p2), %v1022_v4 }
   0xd   : > { %s1245_s22 = smov (!%p233_p3, %s232_s22), 37 }
   0xe   : > { %s854_s6 = sshll.u32 %s1245_s22, 2  ;;  %s856_s20 = sshll.u32 %s1245_s22, 3 }
   0xf   : > { %s1114_s11 = scalar_lea.vmem %s1238_s0, %s854_s6  ;;  %s1119_s14 = scalar_lea.vmem %s1239_s1, %s854_s6  ;;  %941 = vmatpush3.bf16.msra.mxu1 %v1018_v2 }
  0x10   : > { %v1024_v6 = vld [vmem:[%s1114_s11] sm:$0xff]   ;;  %v1025_v7 = vld [vmem:[%s1114_s11 + $0x8] sm:$0xff]   ;;  %942 = vmatprep.subr.bf16.mxu1 %v1019_v5  ;;  %v1028_v10 = vld [vmem:[%s1114_s11 + $0x10] sm:$0xff]   ;;  %s1176_s26 = scalar_lea.vmem %s1243_s5, %s856_s20 }
  0x11   : > { %972 = vmatprep.mubr.msk.bf16.mxu0 %vm592_vm0, %v1024_v6  ;;  %v1026_v8 = vld [vmem:[%s1119_s14] sm:$0xff]   ;;  %v1029_v12 = vld [vmem:[%s1114_s11 + $0x18] sm:$0xff]   ;;  %v1027_v14 = vld [vmem:[%s1119_s14 + $0x8] sm:$0xff]  }
  0x12   : > { %948 = vmatprep.mubr.msk.bf16.mxu1 %vm389_vm1, %v1026_v8  ;;  %973 = vmatmul.mubr.msk.bf16.vlgmr.msra.gmra.mrb[0].mxu0 %vm592_vm0, %v1025_v7  ;;  %v1032_v13 = vld [vmem:[%s1114_s11 + $0x20] sm:$0xff]   ;;  %v1030_v15 = vld [vmem:[%s1119_s14 + $0x10] sm:$0xff]   ;;  %v1033_v16 = vld [vmem:[%s1114_s11 + $0x28] sm:$0xff]  }
  0x13   : > { %943 = vmatpush3.bf16.msra.mxu1 %v1019_v5  ;;  %976 = vmatprep.mubr.msk.bf16.mxu0 %vm592_vm0, %v1028_v10  ;;  %v1036_v17 = vld [vmem:[%s1114_s11 + $0x30] sm:$0xff]   ;;  %v1031_v18 = vld [vmem:[%s1119_s14 + $0x18] sm:$0xff]   ;;  %v1034_v19 = vld [vmem:[%s1119_s14 + $0x20] sm:$0xff]  }
  0x14   : > { %944 = vmatprep.subr.bf16.mxu1 %v1021_v9  ;;  %v1037_v20 = vld [vmem:[%s1114_s11 + $0x38] sm:$0xff]   ;;  %v1040_v21 = vld [vmem:[%s1114_s11 + $0x40] sm:$0xff]   ;;  %v1035_v22 = vld [vmem:[%s1119_s14 + $0x28] sm:$0xff]  }
  0x15   : > { %v1038_v23 = vld [vmem:[%s1119_s14 + $0x30] sm:$0xff]   ;;  %v1041_v24 = vld [vmem:[%s1114_s11 + $0x48] ss:$0 sps:$4 sm:$0xff]   ;;  %v1039_v25 = vld [vmem:[%s1119_s14 + $0x38] sm:$0xff]  }
  0x16   : > { %v1042_v26 = vld [vmem:[%s1119_s14 + $0x40] sm:$0xff]   ;;  %v1043_v27 = vld [vmem:[%s1119_s14 + $0x48] ss:$0 sps:$4 sm:$0xff]  }
  0x17   : > { %945 = vmatpush3.bf16.msra.mxu1 %v1021_v9 }
  0x18   : > { %946 = vmatprep.subr.bf16.mxu1 %v1023_v11 }
  0x1a   : > { %977 = vmatmul.mubr.msk.bf16.gmra.mrb[4].mxu0 %vm592_vm0, %v1029_v12 }
  0x1b   : > { %947 = vmatpush3.bf16.msra.mxu1 %v1023_v11  ;;  %980 = vmatprep.mubr.msk.bf16.mxu0 %vm592_vm0, %v1032_v13 }
  0x1e   : > { %949 = vmatmul.mubr.msk.bf16.vlgmr.msra.gmra.mrb[0].mxu1 %vm389_vm1, %v1027_v14 }
  0x1f   : > { %952 = vmatprep.mubr.msk.bf16.mxu1 %vm389_vm1, %v1030_v15 }
  0x22   : > { %981 = vmatmul.mubr.msk.bf16.gmra.mrb[8].mxu0 %vm592_vm0, %v1033_v16 }
  0x23   : > { %984 = vmatprep.mubr.msk.bf16.mxu0 %vm592_vm0, %v1036_v17 }
  0x26   : > { %953 = vmatmul.mubr.msk.bf16.gmra.mrb[4].mxu1 %vm389_vm1, %v1031_v18 }
  0x27   : > { %956 = vmatprep.mubr.msk.bf16.mxu1 %vm389_vm1, %v1034_v19 }
  0x2a   : > { %985 = vmatmul.mubr.msk.bf16.gmra.mrb[12].mxu0 %vm592_vm0, %v1037_v20 }
  0x2b   : > { %988 = vmatprep.mubr.msk.bf16.mxu0 %vm592_vm0, %v1040_v21 }
  0x2e   : > { %957 = vmatmul.mubr.msk.bf16.gmra.mrb[8].mxu1 %vm389_vm1, %v1035_v22 }
  0x2f   : > { %960 = vmatprep.mubr.msk.bf16.mxu1 %vm389_vm1, %v1038_v23 }
  0x32   : > { %989 = vmatmul.mubr.msk.bf16.gmra.mrb[16].mxu0 %vm592_vm0, %v1041_v24 }
  0x36   : > { %961 = vmatmul.mubr.msk.bf16.gmra.mrb[12].mxu1 %vm389_vm1, %v1039_v25 }
  0x37   : > { %964 = vmatprep.mubr.msk.bf16.mxu1 %vm389_vm1, %v1042_v26 }
  0x3e   : > { %965 = vmatmul.mubr.msk.bf16.gmra.mrb[16].mxu1 %vm389_vm1, %v1043_v27 }
  0xe5   : > { %v974_v28 = vpop.f32.mrb[0].mxu0 }
  0xe6   : > { %v657_v29 = vpop.f32.mrb[1].mxu0 }
  0xe7   : > { %v975_v30 = vpop.f32.mrb[2].mxu0 }
  0xe8   : > { %v660_v31 = vpop.f32.mrb[3].mxu0 }
  0xed   : > { %v978_v32 = vpop.f32.mrb[4].mxu0 }
  0xee   : > { %v673_v33 = vpop.f32.mrb[5].mxu0 }
  0xef   : > { %v979_v34 = vpop.f32.mrb[6].mxu0 }
  0xf0   : > { %v676_v35 = vpop.f32.mrb[7].mxu0 }
  0xf1   : > { %v950_v36 = vpop.f32.mrb[0].mxu1 }
  0xf2   : > { %v666_v38 = vadd.f32 %v974_v28, %v950_v36  ;;  %v454_v39 = vpop.f32.mrb[1].mxu1 }
  0xf3   : > { %v658_v40 = vadd.f32 %v657_v29, %v454_v39  ;;  %v951_v41 = vpop.f32.mrb[2].mxu1 }
  0xf4   : > { %v744_v42 = vadd.f32 %v1171_v37, %v666_v38  ;;  %v669_v43 = vadd.f32 %v975_v30, %v951_v41  ;;  %v457_v44 = vpop.f32.mrb[3].mxu1 }
  0xf5   : > { %v742_v45 = vadd.f32 %v1171_v37, %v658_v40  ;;  %v661_v46 = vadd.f32 %v660_v31, %v457_v44  ;;  %v982_v47 = vpop.f32.mrb[8].mxu0 }
  0xf6   : > { %764 = vst.msk [vmem:[%s1176_s26 + $0x10] sm:$0xff] %vm761_vm2, %v744_v42  ;;  %v745_v48 = vadd.f32 %v1171_v37, %v669_v43  ;;  %v689_v49 = vpop.f32.mrb[9].mxu0 }
  0xf7   : > { %762 = vst.msk [vmem:[%s1176_s26] sm:$0xff] %vm761_vm2, %v742_v45  ;;  %v743_v50 = vadd.f32 %v1171_v37, %v661_v46  ;;  %v983_v51 = vpop.f32.mrb[10].mxu0 }
  0xf8   : > { %765 = vst.msk [vmem:[%s1176_s26 + $0x18] sm:$0xff] %vm761_vm2, %v745_v48  ;;  %v692_v52 = vpop.f32.mrb[11].mxu0 }
  0xf9   : > { %763 = vst.msk [vmem:[%s1176_s26 + $0x8] sm:$0xff] %vm761_vm2, %v743_v50  ;;  %v954_v53 = vpop.f32.mrb[4].mxu1 }
  0xfa   : > { %v682_v54 = vadd.f32 %v978_v32, %v954_v53  ;;  %v470_v55 = vpop.f32.mrb[5].mxu1 }
  0xfb   : > { %v674_v56 = vadd.f32 %v673_v33, %v470_v55  ;;  %v955_v57 = vpop.f32.mrb[6].mxu1 }
  0xfc   : > { %v748_v58 = vadd.f32 %v1171_v37, %v682_v54  ;;  %v685_v59 = vadd.f32 %v979_v34, %v955_v57  ;;  %v473_v60 = vpop.f32.mrb[7].mxu1 }
  0xfd   : > { %v746_v61 = vadd.f32 %v1171_v37, %v674_v56  ;;  %v677_v62 = vadd.f32 %v676_v35, %v473_v60  ;;  %v986_v63 = vpop.f32.mrb[12].mxu0 }
  0xfe   : > { %768 = vst.msk [vmem:[%s1176_s26 + $0x30] sm:$0xff] %vm761_vm2, %v748_v58  ;;  %v749_v0 = vadd.f32 %v1171_v37, %v685_v59  ;;  %v705_v1 = vpop.f32.mrb[13].mxu0 }
  0xff   : > { %766 = vst.msk [vmem:[%s1176_s26 + $0x20] sm:$0xff] %vm761_vm2, %v746_v61  ;;  %v747_v2 = vadd.f32 %v1171_v37, %v677_v62  ;;  %v987_v3 = vpop.f32.mrb[14].mxu0 }
 0x100   : > { %769 = vst.msk [vmem:[%s1176_s26 + $0x38] sm:$0xff] %vm761_vm2, %v749_v0  ;;  %v708_v4 = vpop.f32.mrb[15].mxu0 }
 0x101   : > { %767 = vst.msk [vmem:[%s1176_s26 + $0x28] sm:$0xff] %vm761_vm2, %v747_v2  ;;  %v958_v5 = vpop.f32.mrb[8].mxu1 }
 0x102   : > { %v698_v6 = vadd.f32 %v982_v47, %v958_v5  ;;  %v486_v7 = vpop.f32.mrb[9].mxu1 }
 0x103   : > { %v690_v8 = vadd.f32 %v689_v49, %v486_v7  ;;  %v959_v9 = vpop.f32.mrb[10].mxu1 }
 0x104   : > { %v752_v10 = vadd.f32 %v1171_v37, %v698_v6  ;;  %v701_v11 = vadd.f32 %v983_v51, %v959_v9  ;;  %v489_v12 = vpop.f32.mrb[11].mxu1 }
 0x105   : > { %v750_v13 = vadd.f32 %v1171_v37, %v690_v8  ;;  %v693_v14 = vadd.f32 %v692_v52, %v489_v12  ;;  %v990_v15 = vpop.f32.mrb[16].mxu0 }
 0x106   : > { %772 = vst.msk [vmem:[%s1176_s26 + $0x50] sm:$0xff] %vm761_vm2, %v752_v10  ;;  %v753_v16 = vadd.f32 %v1171_v37, %v701_v11  ;;  %v721_v17 = vpop.f32.mrb[17].mxu0 }
 0x107   : > { %770 = vst.msk [vmem:[%s1176_s26 + $0x40] sm:$0xff] %vm761_vm2, %v750_v13  ;;  %v751_v18 = vadd.f32 %v1171_v37, %v693_v14  ;;  %v991_v19 = vpop.f32.mrb[18].mxu0 }
 0x108   : > { %773 = vst.msk [vmem:[%s1176_s26 + $0x58] sm:$0xff] %vm761_vm2, %v753_v16  ;;  %v724_v20 = vpop.f32.mrb[19].mxu0 }
 0x109   : > { %771 = vst.msk [vmem:[%s1176_s26 + $0x48] sm:$0xff] %vm761_vm2, %v751_v18  ;;  %v962_v21 = vpop.f32.mrb[12].mxu1 }
 0x10a   : > { %v714_v22 = vadd.f32 %v986_v63, %v962_v21  ;;  %v502_v23 = vpop.f32.mrb[13].mxu1 }
 0x10b   : > { %v706_v24 = vadd.f32 %v705_v1, %v502_v23  ;;  %v963_v25 = vpop.f32.mrb[14].mxu1 }
 0x10c   : > { %v756_v26 = vadd.f32 %v1171_v37, %v714_v22  ;;  %v717_v27 = vadd.f32 %v987_v3, %v963_v25  ;;  %v505_v28 = vpop.f32.mrb[15].mxu1 }
 0x10d   : > { %v754_v29 = vadd.f32 %v1171_v37, %v706_v24  ;;  %v709_v30 = vadd.f32 %v708_v4, %v505_v28 }
 0x10e   : > { %776 = vst.msk [vmem:[%s1176_s26 + $0x70] sm:$0xff] %vm761_vm2, %v756_v26  ;;  %v757_v31 = vadd.f32 %v1171_v37, %v717_v27 }
 0x10f   : > { %774 = vst.msk [vmem:[%s1176_s26 + $0x60] sm:$0xff] %vm761_vm2, %v754_v29  ;;  %v755_v32 = vadd.f32 %v1171_v37, %v709_v30 }
 0x110   : > { %777 = vst.msk [vmem:[%s1176_s26 + $0x78] sm:$0xff] %vm761_vm2, %v757_v31 }
 0x111   : > { %775 = vst.msk [vmem:[%s1176_s26 + $0x68] sm:$0xff] %vm761_vm2, %v755_v32  ;;  %v966_v33 = vpop.f32.mrb[16].mxu1 }
 0x112   : > { %v730_v34 = vadd.f32 %v990_v15, %v966_v33  ;;  %v518_v35 = vpop.f32.mrb[17].mxu1 }
 0x113   : > { %v722_v36 = vadd.f32 %v721_v17, %v518_v35  ;;  %v967_v38 = vpop.f32.mrb[18].mxu1 }
 0x114   : > { %v760_v39 = vadd.f32 %v1171_v37, %v730_v34  ;;  %v521_v40 = vpop.f32.mrb[19].mxu1 }
 0x115   : > { %v758_v41 = vadd.f32 %v1171_v37, %v722_v36  ;;  %v725_v42 = vadd.f32 %v724_v20, %v521_v40 }
 0x116   : > { %780 = vst.msk [vmem:[%s1176_s26 + $0x90] sm:$0xff] %vm761_vm2, %v760_v39 }
 0x117   : > { %778 = vst.msk [vmem:[%s1176_s26 + $0x80] sm:$0xff] %vm761_vm2, %v758_v41  ;;  %v759_v43 = vadd.f32 %v1171_v37, %v725_v42 }
 0x119   : > { %779 = vst.msk [vmem:[%s1176_s26 + $0x88] sm:$0xff] %vm761_vm2, %v759_v43 }
 0x11a PF: > { %s15_s18 = sadd.s32 1, %s1050_s18  }
 0x11b   : > { %p12_p4 = scmp.ge.s32.totalorder %s15_s18, 4  }
 0x11d   :  { %14 = sbr.rel (!%p12_p4) target bundleno = 1 (0x1), region = 73 }

</bundles_post_ra>
